<compile_context>
chip_gen: v7x
topology: tpu7x:2x2x1
jax: 0.10.0
libtpu: 0.0.40
codegen_flags: <defaults>
</compile_context>

<pallas_src>
import math
import functools

import jax
import jax.numpy as jnp
from jax.experimental import pallas as pl
from jax.experimental.pallas import tpu as pltpu


# ----------------------------------------------------------------------------
# Kernel: row-wise LayerNorm over the last dim.
#   x_ref : (TR, D) f32     a_ref/b_ref : (1, D) f32     o_ref : (TR, D) f32
# ----------------------------------------------------------------------------
def layer_norm_kernel(x_ref, a_ref, b_ref, o_ref, *, eps, d):
    x = x_ref[...]                                        # (TR, D)
    mean = jnp.mean(x, axis=-1, keepdims=True)            # (TR, 1)
    xc = x - mean
    # torch.std is the unbiased estimator (divide by N-1).
    var = jnp.sum(xc * xc, axis=-1, keepdims=True) / jnp.float32(d - 1)
    std = jnp.sqrt(var)
    o_ref[...] = a_ref[...] * (xc / (std + jnp.float32(eps))) + b_ref[...]


# ----------------------------------------------------------------------------
# Wrapper
# ----------------------------------------------------------------------------
def layer_norm(x, a_2, b_2, eps=1e-7, *, max_block_rows=1024):
    orig_shape = x.shape
    D = orig_shape[-1]
    R = math.prod(orig_shape[:-1]) if len(orig_shape) > 1 else 1

    x2 = x.reshape(R, D).astype(jnp.float32)
    a2 = a_2.reshape(1, D).astype(jnp.float32)
    b2 = b_2.reshape(1, D).astype(jnp.float32)

    # Row tile: multiple of 8 sublanes; a single tile when the input is small
    # so the whole op is one grid step (no per-step pipeline overhead).
    tr = min(max_block_rows, ((R + 7) // 8) * 8)
    n_blocks = pl.cdiv(R, tr)
    Rp = n_blocks * tr
    if Rp != R:
        # Padded rows are all-zero: mean=0, std=0 -> 0/(0+eps)=0, no NaN;
        # they are sliced off below.
        x2 = jnp.pad(x2, ((0, Rp - R), (0, 0)))

    out = pl.pallas_call(
        functools.partial(layer_norm_kernel, eps=float(eps), d=D),
        out_shape=jax.ShapeDtypeStruct((Rp, D), jnp.float32),
        grid=(n_blocks,),
        in_specs=[
            pl.BlockSpec((tr, D), lambda i: (i, 0)),    # x rows
            pl.BlockSpec((1, D), lambda i: (0, 0)),     # a_2 (loaded once)
            pl.BlockSpec((1, D), lambda i: (0, 0)),     # b_2 (loaded once)
        ],
        out_specs=pl.BlockSpec((tr, D), lambda i: (i, 0)),
        compiler_params=pltpu.CompilerParams(
            dimension_semantics=("parallel",)),
    )(x2, a2, b2)

    if Rp != R:
        out = out[:R]
    return out.reshape(orig_shape)


# ----------------------------------------------------------------------------
# Pure-JAX reference (mirrors the PyTorch forward).
# ----------------------------------------------------------------------------
def reference(x, a_2, b_2, eps=1e-7):
    mean = jnp.mean(x, axis=-1, keepdims=True)
    var = jnp.sum((x - mean) ** 2, axis=-1, keepdims=True) / (x.shape[-1] - 1)
    std = jnp.sqrt(var)
    return a_2 * (x - mean) / (std + eps) + b_2


if __name__ == "__main__":
    key = jax.random.PRNGKey(0)
    k1, k2, k3, k4 = jax.random.split(key, 4)

    # Shapes consistent with the aicare model usage: (batch, seq, hidden).
    B, S, D = 2, 20, 32
    x = jax.random.normal(k1, (B, S, D), jnp.float32)
    a_2 = 1.0 + 0.1 * jax.random.normal(k2, (D,), jnp.float32)
    b_2 = 0.05 * jax.random.normal(k3, (D,), jnp.float32)

    out = layer_norm(x, a_2, b_2)
    out = jax.block_until_ready(out)
    ref = reference(x, a_2, b_2)
    assert jnp.allclose(out, ref, rtol=1e-5, atol=1e-5), "layernorm mismatch (small)"

    # Exercise the multi-block (gridded) path too.
    x_big = jax.random.normal(k4, (4, 600, D), jnp.float32)   # 2400 rows > 1024
    out_big = jax.block_until_ready(layer_norm(x_big, a_2, b_2))
    ref_big = reference(x_big, a_2, b_2)
    assert jnp.allclose(out_big, ref_big, rtol=1e-5, atol=1e-5), "layernorm mismatch (big)"

    print("KERNEL_OK")
</pallas_src>

<mosaic_0001>
module attributes {stable_mosaic.version = 11 : i64} {
  func.func @layer_norm_kernel(%arg0: i32, %arg1: memref<40x32xf32, #tpu.memory_space<vmem>>, %arg2: memref<1x32xf32, #tpu.memory_space<vmem>>, %arg3: memref<1x32xf32, #tpu.memory_space<vmem>>, %arg4: memref<40x32xf32, #tpu.memory_space<vmem>>) attributes {dimension_semantics = [#tpu.dimension_semantics<parallel>], iteration_bounds = array<i64: 1>, scalar_prefetch = 0 : i64, scratch_operands = 0 : i64, tpu.core_type = #tpu.core_type<tc>, window_params = [{transform_indices = @transform_0, window_bounds = array<i64: 40, 32>}, {pipeline_mode = #tpu.pipeline_mode<synchronous>, transform_indices = @transform_1, window_bounds = array<i64: 1, 32>}, {pipeline_mode = #tpu.pipeline_mode<synchronous>, transform_indices = @transform_2, window_bounds = array<i64: 1, 32>}, {transform_indices = @transform_3, window_bounds = array<i64: 40, 32>}]} {
    %c0 = arith.constant 0 : index
    %c0_0 = arith.constant 0 : index
    %0 = vector.load %arg1[%c0, %c0_0] : memref<40x32xf32, #tpu.memory_space<vmem>>, vector<40x32xf32>
    %cst = arith.constant dense<0.000000e+00> : vector<40xf32>
    %1 = vector.multi_reduction <add>, %0, %cst [1] : vector<40x32xf32> to vector<40xf32>
    %2 = vector.shape_cast %1 : vector<40xf32> to vector<40x1xf32>
    %cst_1 = arith.constant 3.200000e+01 : f32
    %3 = vector.broadcast %cst_1 : f32 to vector<40x1xf32>
    %4 = arith.divf %2, %3 : vector<40x1xf32>
    %5 = vector.broadcast %4 : vector<40x1xf32> to vector<40x32xf32>
    %6 = arith.subf %0, %5 : vector<40x32xf32>
    %7 = arith.mulf %6, %6 : vector<40x32xf32>
    %cst_2 = arith.constant dense<0.000000e+00> : vector<40xf32>
    %8 = vector.multi_reduction <add>, %7, %cst_2 [1] : vector<40x32xf32> to vector<40xf32>
    %9 = vector.shape_cast %8 : vector<40xf32> to vector<40x1xf32>
    %cst_3 = arith.constant 3.100000e+01 : f32
    %10 = vector.broadcast %cst_3 : f32 to vector<40x1xf32>
    %11 = arith.divf %9, %10 : vector<40x1xf32>
    %12 = math.sqrt %11 : vector<40x1xf32>
    %c0_4 = arith.constant 0 : index
    %c0_5 = arith.constant 0 : index
    %13 = vector.load %arg2[%c0_4, %c0_5] : memref<1x32xf32, #tpu.memory_space<vmem>>, vector<1x32xf32>
    %cst_6 = arith.constant 1.000000e-07 : f32
    %14 = vector.broadcast %cst_6 : f32 to vector<40x1xf32>
    %15 = arith.addf %12, %14 : vector<40x1xf32>
    %16 = vector.broadcast %15 : vector<40x1xf32> to vector<40x32xf32>
    %17 = arith.divf %6, %16 : vector<40x32xf32>
    %18 = vector.broadcast %13 : vector<1x32xf32> to vector<40x32xf32>
    %19 = arith.mulf %18, %17 : vector<40x32xf32>
    %c0_7 = arith.constant 0 : index
    %c0_8 = arith.constant 0 : index
    %20 = vector.load %arg3[%c0_7, %c0_8] : memref<1x32xf32, #tpu.memory_space<vmem>>, vector<1x32xf32>
    %21 = vector.broadcast %20 : vector<1x32xf32> to vector<40x32xf32>
    %22 = arith.addf %19, %21 : vector<40x32xf32>
    %c0_9 = arith.constant 0 : index
    %c0_10 = arith.constant 0 : index
    %23 = vector.load %arg4[%c0_9, %c0_10] : memref<40x32xf32, #tpu.memory_space<vmem>>, vector<40x32xf32>
    tpu.vector_store %arg4[%c0_9, %c0_10], %22 {strides = array<i32>} : memref<40x32xf32, #tpu.memory_space<vmem>>, vector<40x32xf32>,
    return
  }
  func.func @transform_0(%arg0: i32) -> (i32, i32) {
    %c0_i32 = arith.constant 0 : i32
    %c0_i32_0 = arith.constant 0 : i32
    return %arg0, %c0_i32 : i32, i32
  }
  func.func @transform_1(%arg0: i32) -> (i32, i32) {
    %c0_i32 = arith.constant 0 : i32
    %c0_i32_0 = arith.constant 0 : i32
    %c0_i32_1 = arith.constant 0 : i32
    return %c0_i32, %c0_i32_0 : i32, i32
  }
  func.func @transform_2(%arg0: i32) -> (i32, i32) {
    %c0_i32 = arith.constant 0 : i32
    %c0_i32_0 = arith.constant 0 : i32
    %c0_i32_1 = arith.constant 0 : i32
    return %c0_i32, %c0_i32_0 : i32, i32
  }
  func.func @transform_3(%arg0: i32) -> (i32, i32) {
    %c0_i32 = arith.constant 0 : i32
    %c0_i32_0 = arith.constant 0 : i32
    return %arg0, %c0_i32 : i32, i32
  }
}

</mosaic_0001>

<bundles_post_ra>
// kernel: tpu_custom_call.1
= control target key start
LH: loop header
LB: loop body
LE: loop exit
PB: predicated region body
PF: predicated region fallthrough
CT: control target
= control target key end

     0   :  { %vm19_vm0 = vcmask 261120   ;;  %s273_s0 = inlined_call_operand.vmem [shape: f32[40,32], index: 0, kind: input, shape index: {}]   ;;  %s274_s1 = inlined_call_operand.vmem [shape: f32[1,32], index: 1, kind: input, shape index: {}]   ;;  %s275_s2 = inlined_call_operand.vmem [shape: f32[1,32], index: 2, kind: input, shape index: {}]   ;;  %s276_s3 = inlined_call_operand.vmem [shape: f32[40,32], index: 3, kind: output, shape index: {}]  }
   0x1   :  { %v14_v0 = vld [vmem:[%s273_s0] sm:$0xff]  ;;  %v16_v1 = vld [vmem:[%s273_s0 + $0x10] sm:$0xff]  ;;  %v15_v2 = vld [vmem:[%s273_s0 + $0x8] sm:$0xff] }
   0x2   :  { %v20_v3 = vsel %vm19_vm0, %v14_v0, 0.0  ;;  %v26_v4 = vsel %vm19_vm0, %v16_v1, 0.0  ;;  %v17_v5 = vld [vmem:[%s273_s0 + $0x18] sm:$0xff]  ;;  %v23_v6 = vsel %vm19_vm0, %v15_v2, 0.0  ;;  %v18_v8 = vld [vmem:[%s273_s0 + $0x20] sm:$0xff] }
   0x3   :  { %21 = vadd.xlane.f32.xlu0 %v20_v3  ;;  %27 = vadd.xlane.f32.xlu1 %v26_v4  ;;  %v29_v7 = vsel %vm19_vm0, %v17_v5, 0.0  ;;  %v32_v9 = vsel %vm19_vm0, %v18_v8, 0.0 }
   0x7   :  { %24 = vadd.xlane.f32.xlu0 %v23_v6  ;;  %30 = vadd.xlane.f32.xlu1 %v29_v7 }
   0xb   :  { %33 = vadd.xlane.f32.xlu0 %v32_v9 }
  0x90   :  { %v22_v10 = vpop.xlane.xlu0 %21  ;;  %v28_v11 = vpop.xlane.xlu1 %27 }
  0x91   :  { %v36_v12 = vmul.f32 0.03125, %v22_v10  ;;  %v38_v13 = vmul.f32 0.03125, %v28_v11 }
  0x93   :  { %v217_v14 = vsub.f32 %v14_v0, %v36_v12  ;;  %v219_v15 = vsub.f32 %v16_v1, %v38_v13  ;;  %v155_v12 = vld [vmem:[%s274_s1] ss:$0 sm:$0xff] }
  0x94   :  { %v25_v16 = vpop.xlane.xlu0 %24  ;;  %v31_v17 = vpop.xlane.xlu1 %30 }
  0x95   :  { %v37_v18 = vmul.f32 0.03125, %v25_v16  ;;  %v39_v19 = vmul.f32 0.03125, %v31_v17  ;;  %v46_v20 = vmul.f32 %v217_v14, %v217_v14  ;;  %v48_v21 = vmul.f32 %v219_v15, %v219_v15  ;;  %v156_v16 = vld [vmem:[%s275_s2] ss:$0 sm:$0xff] }
  0x97   :  { %v225_v22 = vsub.f32 %v15_v2, %v37_v18  ;;  %v227_v23 = vsub.f32 %v17_v5, %v39_v19  ;;  %v51_v24 = vsel %vm19_vm0, %v46_v20, 0.0  ;;  %v57_v27 = vsel %vm19_vm0, %v48_v21, 0.0 }
  0x98   :  { %52 = vadd.xlane.f32.xlu1 %v51_v24  ;;  %v34_v25 = vpop.xlane.xlu0 %33 }
  0x99   :  { %v40_v26 = vmul.f32 0.03125, %v34_v25  ;;  %v47_v28 = vmul.f32 %v225_v22, %v225_v22  ;;  %v49_v29 = vmul.f32 %v227_v23, %v227_v23 }
  0x9b   :  { %v235_v30 = vsub.f32 %v18_v8, %v40_v26  ;;  %v54_v31 = vsel %vm19_vm0, %v47_v28, 0.0  ;;  %v60_v32 = vsel %vm19_vm0, %v49_v29, 0.0 }
  0x9c   :  { %58 = vadd.xlane.f32.xlu1 %v57_v27  ;;  %55 = vadd.xlane.f32.xlu0 %v54_v31 }
  0x9d   :  { %v50_v33 = vmul.f32 %v235_v30, %v235_v30 }
  0x9f   :  { %v63_v34 = vsel %vm19_vm0, %v50_v33, 0.0 }
  0xa0   :  { %61 = vadd.xlane.f32.xlu0 %v60_v32  ;;  %64 = vadd.xlane.f32.xlu1 %v63_v34 }
 0x125   :  { %v53_v35 = vpop.xlane.xlu1 %52 }
 0x126   :  { %v67_v36 = vmul.f32 0.032258064, %v53_v35 }
 0x128   :  { %157 = vrsqrt.f32 %v67_v36  ;;  %vm74_vm1 = vcmp.eq.f32.partialorder %v67_v36, inf  ;;  %v77_v47 = vand.u32 2147483648, %v67_v36  ;;  %vm76_vm2 = vcmp.eq.f32.partialorder %v67_v36, 0.0 }
 0x129   :  { %v59_v37 = vpop.xlane.xlu1 %58  ;;  %v56_v38 = vpop.xlane.xlu0 %55 }
 0x12a   :  { %v69_v39 = vmul.f32 0.032258064, %v59_v37  ;;  %v68_v40 = vmul.f32 0.032258064, %v56_v38 }
 0x12c   :  { %159 = vrsqrt.f32 %v69_v39  ;;  %vm88_vm3 = vcmp.eq.f32.partialorder %v69_v39, inf  ;;  %vm90_vm4 = vcmp.eq.f32.partialorder %v69_v39, 0.0  ;;  %v91_v54 = vand.u32 2147483648, %v69_v39 }
 0x12d   :  { %161 = vrsqrt.f32 %v68_v40  ;;  %v65_v41 = vpop.xlane.xlu1 %64  ;;  %v62_v42 = vpop.xlane.xlu0 %61  ;;  %vm81_vm5 = vcmp.eq.f32.partialorder %v68_v40, inf  ;;  %v84_v57 = vand.u32 2147483648, %v68_v40  ;;  %vm83_vm6 = vcmp.eq.f32.partialorder %v68_v40, 0.0 }
 0x12e   :  { %v71_v43 = vmul.f32 0.032258064, %v65_v41  ;;  %v70_v44 = vmul.f32 0.032258064, %v62_v42 }
 0x130   :  { %163 = vrsqrt.f32 %v71_v43  ;;  %vm102_vm7 = vcmp.eq.f32.partialorder %v71_v43, inf  ;;  %vm104_vm8 = vcmp.eq.f32.partialorder %v71_v43, 0.0  ;;  %v105_v2 = vand.u32 2147483648, %v71_v43 }
 0x131   :  { %165 = vrsqrt.f32 %v70_v44  ;;  %vm95_vm9 = vcmp.eq.f32.partialorder %v70_v44, inf  ;;  %v98_v5 = vand.u32 2147483648, %v70_v44  ;;  %vm97_vm10 = vcmp.eq.f32.partialorder %v70_v44, 0.0 }
 0x132   :  { %v158_v45 = vpop.eup %157 }
 0x133   :  { %v73_v46 = vmul.f32 %v158_v45, %v67_v36 }
 0x135   :  { %v75_v48 = vsel %vm74_vm1, %v67_v36, %v73_v46 }
 0x136   :  { %v160_v49 = vpop.eup %159  ;;  %v78_v50 = vsel %vm76_vm2, %v77_v47, %v75_v48 }
 0x137   :  { %v162_v51 = vpop.eup %161  ;;  %v108_v52 = vadd.f32 1e-07, %v78_v50  ;;  %v87_v53 = vmul.f32 %v160_v49, %v69_v39 }
 0x138   :  { %v80_v55 = vmul.f32 %v162_v51, %v68_v40 }
 0x139   :  { %167 = vrcp.f32 %v108_v52  ;;  %v89_v56 = vsel %vm88_vm3, %v69_v39, %v87_v53 }
 0x13a   :  { %v164_v58 = vpop.eup %163  ;;  %v92_v59 = vsel %vm90_vm4, %v91_v54, %v89_v56  ;;  %v82_v60 = vsel %vm81_vm5, %v68_v40, %v80_v55 }
 0x13b   :  { %v166_v61 = vpop.eup %165  ;;  %v110_v62 = vadd.f32 1e-07, %v92_v59  ;;  %v85_v63 = vsel %vm83_vm6, %v84_v57, %v82_v60  ;;  %v101_v0 = vmul.f32 %v164_v58, %v71_v43 }
 0x13c   :  { %v109_v1 = vadd.f32 1e-07, %v85_v63  ;;  %v94_v3 = vmul.f32 %v166_v61, %v70_v44 }
 0x13d   :  { %169 = vrcp.f32 %v110_v62  ;;  %v103_v4 = vsel %vm102_vm7, %v71_v43, %v101_v0 }
 0x13e   :  { %171 = vrcp.f32 %v109_v1  ;;  %v106_v6 = vsel %vm104_vm8, %v105_v2, %v103_v4  ;;  %v96_v7 = vsel %vm95_vm9, %v70_v44, %v94_v3 }
 0x13f   :  { %v112_v8 = vadd.f32 1e-07, %v106_v6  ;;  %v99_v9 = vsel %vm97_vm10, %v98_v5, %v96_v7 }
 0x140   :  { %v111_v10 = vadd.f32 1e-07, %v99_v9 }
 0x141   :  { %173 = vrcp.f32 %v112_v8 }
 0x142   :  { %175 = vrcp.f32 %v111_v10 }
 0x143   :  { %v168_v11 = vpop.eup %167 }
 0x144   :  { %v114_v13 = vmul.f32 %v168_v11, %v217_v14 }
 0x146   :  { %v129_v17 = vmul.f32 %v155_v12, %v114_v13 }
 0x147   :  { %v170_v18 = vpop.eup %169 }
 0x148   :  { %v172_v19 = vpop.eup %171  ;;  %v141_v20 = vadd.f32 %v156_v16, %v129_v17  ;;  %v118_v21 = vmul.f32 %v170_v18, %v219_v15 }
 0x149   :  { %v116_v24 = vmul.f32 %v172_v19, %v225_v22 }
 0x14a   :  { %146 = vst.msk [vmem:[%s276_s3] sm:$0xff] %vm19_vm0, %v141_v20  ;;  %v131_v25 = vmul.f32 %v155_v12, %v118_v21 }
 0x14b   :  { %v174_v26 = vpop.eup %173  ;;  %v130_v14 = vmul.f32 %v155_v12, %v116_v24 }
 0x14c   :  { %v176_v27 = vpop.eup %175  ;;  %v143_v28 = vadd.f32 %v156_v16, %v131_v25  ;;  %v122_v29 = vmul.f32 %v174_v26, %v235_v30 }
 0x14d   :  { %v142_v31 = vadd.f32 %v156_v16, %v130_v14  ;;  %v120_v32 = vmul.f32 %v176_v27, %v227_v23 }
 0x14e   :  { %148 = vst.msk [vmem:[%s276_s3 + $0x10] sm:$0xff] %vm19_vm0, %v143_v28  ;;  %v133_v15 = vmul.f32 %v155_v12, %v122_v29 }
 0x14f   :  { %147 = vst.msk [vmem:[%s276_s3 + $0x8] sm:$0xff] %vm19_vm0, %v142_v31  ;;  %v132_v22 = vmul.f32 %v155_v12, %v120_v32 }
 0x150   :  { %v145_v33 = vadd.f32 %v156_v16, %v133_v15 }
 0x151   :  { %v144_v34 = vadd.f32 %v156_v16, %v132_v22 }
 0x152   :  { %150 = vst.msk [vmem:[%s276_s3 + $0x20] sm:$0xff] %vm19_vm0, %v145_v33 }
 0x153   :  { %149 = vst.msk [vmem:[%s276_s3 + $0x18] sm:$0xff] %vm19_vm0, %v144_v34 }

</bundles_post_ra>
